<compile_context>
chip_gen: v6e
topology: v6e:2x2x1
jax: 0.10.0
libtpu: 0.0.40
codegen_flags: <defaults>
</compile_context>

<pallas_src>
import math
import jax
import jax.numpy as jnp
from jax import lax
from jax.experimental import pallas as pl
from jax.experimental.pallas import tpu as pltpu

_MIB = 1024 * 1024
_SQRT_HALF = 0.7071067811865476


def _round_up(x, m):
    return ((x + m - 1) // m) * m


def _device_kind():
    try:
        return jax.devices()[0].device_kind.lower()
    except Exception:
        return ""


def _phys_vmem_bytes(kind):
    # Per-TensorCore VMEM: 64 MiB on v7x, 128 MiB on v5e/v6e.
    by_kind = 64 * _MIB if ("v7" in kind or "7x" in kind) else 128 * _MIB
    try:
        info = int(pltpu.get_tpu_info().vmem_capacity_bytes)
        return min(info, by_kind)
    except Exception:
        return by_kind


def _min_sublane(dtype):
    # dtype-dependent minimum sublane tile: 8 (f32) / 16 (bf16) / 32 (int8, fp8).
    return max(8, 32 // max(1, jnp.dtype(dtype).itemsize))


def _gelu_exact(h):
    # Exact (erf) GELU, matching torch.nn.GELU() default.
    return 0.5 * h * (1.0 + lax.erf(h * _SQRT_HALF))


# ----------------------------- kernels ---------------------------------------


def _ff_kernel_resident(x_ref, w1_ref, b1_ref, w2_ref, b2_ref, o_ref):
    # Weights fully VMEM-resident (constant block index -> DMA'd from HBM once).
    # x_ref: (tm, dim_p)  w1_ref: (dim_p, mlp_p)  b1_ref: (1, mlp_p)
    # w2_ref: (mlp_p, dim_p)  b2_ref: (1, dim_p)  o_ref: (tm, dim_p)
    h = jnp.dot(x_ref[...], w1_ref[...], preferred_element_type=jnp.float32)
    h = _gelu_exact(h + b1_ref[...].astype(jnp.float32))
    out = jnp.dot(h.astype(w2_ref.dtype), w2_ref[...],
                  preferred_element_type=jnp.float32)
    o_ref[...] = (out + b2_ref[...].astype(jnp.float32)).astype(o_ref.dtype)


def _ff_kernel_tiled(x_ref, w1_ref, b1_ref, w2_ref, b2_ref, o_ref, acc_ref):
    # Grid: (row_tiles, hidden_tiles). Axis 1 reduces over mlp_dim tiles.
    j = pl.program_id(1)

    @pl.when(j == 0)
    def _():
        acc_ref[...] = jnp.zeros_like(acc_ref)

    h = jnp.dot(x_ref[...], w1_ref[...], preferred_element_type=jnp.float32)
    h = _gelu_exact(h + b1_ref[...].astype(jnp.float32))
    acc_ref[...] += jnp.dot(h.astype(w2_ref.dtype), w2_ref[...],
                            preferred_element_type=jnp.float32)

    @pl.when(j == pl.num_programs(1) - 1)
    def _():
        o_ref[...] = (acc_ref[...] + b2_ref[...].astype(jnp.float32)).astype(o_ref.dtype)


# ----------------------------- wrapper ----------------------------------------


def prepare_feed_forward(w1, b1, w2, b2, *, tm=None, tn=None, compute_dtype=None):
    """Pads/casts the static weights ONCE and picks a per-generation tiling plan."""
    dim, mlp_dim = w1.shape
    if compute_dtype is not None:
        w1 = w1.astype(compute_dtype)
        b1 = b1.astype(compute_dtype)
        w2 = w2.astype(compute_dtype)
        b2 = b2.astype(compute_dtype)

    kind = _device_kind()
    phys = _phys_vmem_bytes(kind)
    budget = int(0.75 * phys)
    # 256-lane alignment for the 256x256 MXU on v6e/v7x, 128 on v5e.
    lane = 256 if ("v6" in kind or "v7" in kind or "7x" in kind) else 128
    itemsize = jnp.dtype(w1.dtype).itemsize

    # Default row tile: past the compute/BW knee on each generation.
    tm_cap = int(tm) if tm is not None else (1024 if "v6" in kind else 512)
    tm_cap = max(8, tm_cap)

    dim_p = _round_up(dim, lane)

    # --- Plan A: weights VMEM-resident (weights cross HBM once total). ---------
    mlp_res = _round_up(mlp_dim, lane)

    def _resident_bytes(tm_):
        w = (2 * dim_p * mlp_res + mlp_res + dim_p) * itemsize   # W1 + W2 + b1 + b2
        io = 2 * tm_ * dim_p * itemsize                          # x tile + out tile
        h = 2 * tm_ * mlp_res * 4                                # f32 intermediate (+slack)
        return 2 * (w + io) + h                                  # 2x: double-buffered blocks

    if _resident_bytes(tm_cap) <= budget:
        est = _resident_bytes(tm_cap)
        plan = dict(mode="resident", dim=dim, mlp=mlp_dim, dim_p=dim_p,
                    mlp_p=mlp_res, tm_cap=tm_cap, tn=mlp_res)
    else:
        # --- Plan B: stream W1/W2 through pipelined hidden tiles. --------------
        mlp128 = _round_up(mlp_dim, 128)
        cands = (512, 256) if lane == 256 else (512, 256, 128)
        tn_ = int(tn) if tn is not None else min(
            cands, key=lambda t: (_round_up(mlp128, t) - mlp128, -t))
        tn_ = max(128, min(_round_up(tn_, 128), mlp128))

        def _tiled_bytes(tm_, tn__):
            blocks = (2 * tm_ * dim_p + 2 * tn__ * dim_p + tn__ + dim_p) * itemsize
            return 2 * blocks + tm_ * dim_p * 4 + 2 * tm_ * tn__ * 4

        tm2, tn2 = tm_cap, tn_
        while tm2 > 256 and _tiled_bytes(tm2, tn2) > budget:
            tm2 = max(256, tm2 // 2)
        while tn2 > 128 and _tiled_bytes(tm2, tn2) > budget:
            tn2 //= 2
        est = _tiled_bytes(tm2, tn2)
        plan = dict(mode="tiled", dim=dim, mlp=mlp_dim, dim_p=dim_p,
                    mlp_p=_round_up(mlp128, tn2), tm_cap=tm2, tn=tn2)

    plan["device_kind"] = kind
    plan["vmem_limit"] = int(min(est * 1.5 + 8 * _MIB, 0.9 * phys))
    plan["compute_dtype"] = compute_dtype

    def _pad2(a, r, c):
        pr, pc = r - a.shape[0], c - a.shape[1]
        return a if (pr == 0 and pc == 0) else jnp.pad(a, ((0, pr), (0, pc)))

    mlp_p = plan["mlp_p"]
    plan["params"] = (
        _pad2(w1, dim_p, mlp_p),               # W1
        _pad2(b1.reshape(1, -1), 1, mlp_p),    # b1
        _pad2(w2, mlp_p, dim_p),               # W2
        _pad2(b2.reshape(1, -1), 1, dim_p),    # b2
    )
    return plan


def feed_forward(x, plan):
    """x: (..., dim) -> (..., dim). Dropout p=0.0 / eval => identity (omitted)."""
    dim, dim_p, mlp_p = plan["dim"], plan["dim_p"], plan["mlp_p"]
    assert x.shape[-1] == dim
    w1p, b1p, w2p, b2p = plan["params"]

    rows = math.prod(x.shape[:-1])
    x2 = x.reshape(rows, dim)
    if plan["compute_dtype"] is not None:
        x2 = x2.astype(plan["compute_dtype"])

    min_tm = max(_min_sublane(x2.dtype), _min_sublane(x.dtype))
    rows_al = _round_up(rows, min_tm)
    tm = _round_up(min(plan["tm_cap"], rows_al), min_tm)
    # v7x: keep >=2 row tiles so both TensorCores get work on the "parallel" axis.
    # TODO(synk): evaluate pltpu.CORE_PARALLEL / pl.core_map for explicit per-core split.
    if "v7" in plan["device_kind"] or "7x" in plan["device_kind"]:
        while tm > min_tm and pl.cdiv(rows_al, tm) < 2:
            tm = max(min_tm, _round_up(tm // 2, min_tm))
    rows_p = _round_up(rows, tm)

    if rows_p != rows or dim_p != dim:
        # Zero-padding is exact: padded hidden cols give gelu(0)*0-weights, padded
        # output rows/cols are sliced off below.
        # TODO(synk): a masked last row-tile would avoid this activation copy.
        x2 = jnp.pad(x2, ((0, rows_p - rows), (0, dim_p - dim)))

    out_dtype = x.dtype

    if plan["mode"] == "resident":
        out = pl.pallas_call(
            _ff_kernel_resident,
            out_shape=jax.ShapeDtypeStruct((rows_p, dim_p), out_dtype),
            grid_spec=pltpu.PrefetchScalarGridSpec(
                num_scalar_prefetch=0,
                grid=(rows_p // tm,),
                in_specs=[
                    pl.BlockSpec((tm, dim_p), lambda i: (i, 0)),     # x row tile
                    pl.BlockSpec((dim_p, mlp_p), lambda i: (0, 0)),  # W1 (resident)
                    pl.BlockSpec((1, mlp_p), lambda i: (0, 0)),      # b1
                    pl.BlockSpec((mlp_p, dim_p), lambda i: (0, 0)),  # W2 (resident)
                    pl.BlockSpec((1, dim_p), lambda i: (0, 0)),      # b2
                ],
                out_specs=pl.BlockSpec((tm, dim_p), lambda i: (i, 0)),
            ),
            compiler_params=pltpu.CompilerParams(
                dimension_semantics=("parallel",),
                vmem_limit_bytes=plan["vmem_limit"],
            ),
        )(x2, w1p, b1p, w2p, b2p)
    else:
        tn = plan["tn"]
        out = pl.pallas_call(
            _ff_kernel_tiled,
            out_shape=jax.ShapeDtypeStruct((rows_p, dim_p), out_dtype),
            grid_spec=pltpu.PrefetchScalarGridSpec(
                num_scalar_prefetch=0,
                grid=(rows_p // tm, mlp_p // tn),
                in_specs=[
                    pl.BlockSpec((tm, dim_p), lambda i, j: (i, 0)),  # x row tile
                    pl.BlockSpec((dim_p, tn), lambda i, j: (0, j)),  # W1 hidden tile
                    pl.BlockSpec((1, tn), lambda i, j: (0, j)),      # b1 hidden tile
                    pl.BlockSpec((tn, dim_p), lambda i, j: (j, 0)),  # W2 hidden tile
                    pl.BlockSpec((1, dim_p), lambda i, j: (0, 0)),   # b2 (constant)
                ],
                out_specs=pl.BlockSpec((tm, dim_p), lambda i, j: (i, 0)),
                scratch_shapes=[pltpu.VMEM((tm, dim_p), jnp.float32)],
            ),
            compiler_params=pltpu.CompilerParams(
                dimension_semantics=("parallel", "arbitrary"),
                vmem_limit_bytes=plan["vmem_limit"],
            ),
        )(x2, w1p, b1p, w2p, b2p)

    return out[:rows, :dim].reshape(x.shape)


def _reference(x, w1, b1, w2, b2):
    h = x @ w1 + b1
    h = 0.5 * h * (1.0 + lax.erf(h / jnp.sqrt(2.0)))
    return h @ w2 + b2


if __name__ == "__main__":
    # Small shapes consistent with the module: tokens of width `dim`.
    B, S, dim, mlp_dim = 2, 8, 32, 64

    key = jax.random.PRNGKey(0)
    kx, kw1, kb1, kw2, kb2 = jax.random.split(key, 5)

    x = jax.random.normal(kx, (B, S, dim), dtype=jnp.float32)

    # Deterministic PyTorch-style Linear init: U(-1/sqrt(fan_in), 1/sqrt(fan_in)).
    bound1 = 1.0 / math.sqrt(dim)
    w1 = jax.random.uniform(kw1, (dim, mlp_dim), jnp.float32, -bound1, bound1)
    b1 = jax.random.uniform(kb1, (mlp_dim,), jnp.float32, -bound1, bound1)
    bound2 = 1.0 / math.sqrt(mlp_dim)
    w2 = jax.random.uniform(kw2, (mlp_dim, dim), jnp.float32, -bound2, bound2)
    b2 = jax.random.uniform(kb2, (dim,), jnp.float32, -bound2, bound2)

    # Weight padding / tiling plan is computed once (hoisted out of the hot path).
    plan = prepare_feed_forward(w1, b1, w2, b2)

    y = feed_forward(x, plan)
    y = jax.block_until_ready(y)

    y_ref = _reference(x, w1, b1, w2, b2)
    assert y.shape == (B, S, dim)
    assert jnp.allclose(y, y_ref, atol=1e-5, rtol=1e-5), "mismatch vs reference"

    print("KERNEL_OK")
</pallas_src>

<mosaic_0001>
module attributes {stable_mosaic.version = 11 : i64} {
  func.func @_ff_kernel_resident(%arg0: i32, %arg1: memref<16x128xf32, #tpu.memory_space<vmem>>, %arg2: memref<128x128xf32, #tpu.memory_space<vmem>>, %arg3: memref<1x128xf32, #tpu.memory_space<vmem>>, %arg4: memref<128x128xf32, #tpu.memory_space<vmem>>, %arg5: memref<1x128xf32, #tpu.memory_space<vmem>>, %arg6: memref<16x128xf32, #tpu.memory_space<vmem>>) attributes {dimension_semantics = [#tpu.dimension_semantics<parallel>], iteration_bounds = array<i64: 1>, scalar_prefetch = 0 : i64, scratch_operands = 0 : i64, tpu.core_type = #tpu.core_type<tc>, window_params = [{transform_indices = @transform_0, window_bounds = array<i64: 16, 128>}, {pipeline_mode = #tpu.pipeline_mode<synchronous>, transform_indices = @transform_1, window_bounds = array<i64: 128, 128>}, {pipeline_mode = #tpu.pipeline_mode<synchronous>, transform_indices = @transform_2, window_bounds = array<i64: 1, 128>}, {pipeline_mode = #tpu.pipeline_mode<synchronous>, transform_indices = @transform_3, window_bounds = array<i64: 128, 128>}, {pipeline_mode = #tpu.pipeline_mode<synchronous>, transform_indices = @transform_4, window_bounds = array<i64: 1, 128>}, {transform_indices = @transform_5, window_bounds = array<i64: 16, 128>}]} {
    %c0 = arith.constant 0 : index
    %c0_0 = arith.constant 0 : index
    %0 = vector.load %arg1[%c0, %c0_0] : memref<16x128xf32, #tpu.memory_space<vmem>>, vector<16x128xf32>
    %c0_1 = arith.constant 0 : index
    %c0_2 = arith.constant 0 : index
    %1 = vector.load %arg2[%c0_1, %c0_2] : memref<128x128xf32, #tpu.memory_space<vmem>>, vector<128x128xf32>
    %cst = arith.constant dense<0.000000e+00> : vector<16x128xf32>
    %2 = tpu.matmul %0, %1, %cst {dimension_numbers = #tpu.dot_dimension_numbers<[1], [0], [0], [1], [0, 0, 1, 1], [], []>} : vector<16x128xf32>, vector<128x128xf32>, vector<16x128xf32> -> vector<16x128xf32>
    %c0_3 = arith.constant 0 : index
    %c0_4 = arith.constant 0 : index
    %3 = vector.load %arg3[%c0_3, %c0_4] : memref<1x128xf32, #tpu.memory_space<vmem>>, vector<1x128xf32>
    %4 = vector.broadcast %3 : vector<1x128xf32> to vector<16x128xf32>
    %5 = arith.addf %2, %4 : vector<16x128xf32>
    %cst_5 = arith.constant 5.000000e-01 : f32
    %6 = vector.broadcast %cst_5 : f32 to vector<16x128xf32>
    %7 = arith.mulf %6, %5 : vector<16x128xf32>
    %cst_6 = arith.constant 0.707106769 : f32
    %8 = vector.broadcast %cst_6 : f32 to vector<16x128xf32>
    %9 = arith.mulf %5, %8 : vector<16x128xf32>
    %10 = math.erf %9 : vector<16x128xf32>
    %cst_7 = arith.constant 1.000000e+00 : f32
    %11 = vector.broadcast %cst_7 : f32 to vector<16x128xf32>
    %12 = arith.addf %11, %10 : vector<16x128xf32>
    %13 = arith.mulf %7, %12 : vector<16x128xf32>
    %c0_8 = arith.constant 0 : index
    %c0_9 = arith.constant 0 : index
    %14 = vector.load %arg4[%c0_8, %c0_9] : memref<128x128xf32, #tpu.memory_space<vmem>>, vector<128x128xf32>
    %cst_10 = arith.constant dense<0.000000e+00> : vector<16x128xf32>
    %15 = tpu.matmul %13, %14, %cst_10 {dimension_numbers = #tpu.dot_dimension_numbers<[1], [0], [0], [1], [0, 0, 1, 1], [], []>} : vector<16x128xf32>, vector<128x128xf32>, vector<16x128xf32> -> vector<16x128xf32>
    %c0_11 = arith.constant 0 : index
    %c0_12 = arith.constant 0 : index
    %16 = vector.load %arg5[%c0_11, %c0_12] : memref<1x128xf32, #tpu.memory_space<vmem>>, vector<1x128xf32>
    %17 = vector.broadcast %16 : vector<1x128xf32> to vector<16x128xf32>
    %18 = arith.addf %15, %17 : vector<16x128xf32>
    %c0_13 = arith.constant 0 : index
    %c0_14 = arith.constant 0 : index
    %19 = vector.load %arg6[%c0_13, %c0_14] : memref<16x128xf32, #tpu.memory_space<vmem>>, vector<16x128xf32>
    tpu.vector_store %arg6[%c0_13, %c0_14], %18 {strides = array<i32>} : memref<16x128xf32, #tpu.memory_space<vmem>>, vector<16x128xf32>,
    return
  }
  func.func @transform_0(%arg0: i32) -> (i32, i32) {
    %c0_i32 = arith.constant 0 : i32
    %c0_i32_0 = arith.constant 0 : i32
    return %arg0, %c0_i32 : i32, i32
  }
  func.func @transform_1(%arg0: i32) -> (i32, i32) {
    %c0_i32 = arith.constant 0 : i32
    %c0_i32_0 = arith.constant 0 : i32
    %c0_i32_1 = arith.constant 0 : i32
    return %c0_i32, %c0_i32_0 : i32, i32
  }
  func.func @transform_2(%arg0: i32) -> (i32, i32) {
    %c0_i32 = arith.constant 0 : i32
    %c0_i32_0 = arith.constant 0 : i32
    %c0_i32_1 = arith.constant 0 : i32
    return %c0_i32, %c0_i32_0 : i32, i32
  }
  func.func @transform_3(%arg0: i32) -> (i32, i32) {
    %c0_i32 = arith.constant 0 : i32
    %c0_i32_0 = arith.constant 0 : i32
    %c0_i32_1 = arith.constant 0 : i32
    return %c0_i32, %c0_i32_0 : i32, i32
  }
  func.func @transform_4(%arg0: i32) -> (i32, i32) {
    %c0_i32 = arith.constant 0 : i32
    %c0_i32_0 = arith.constant 0 : i32
    %c0_i32_1 = arith.constant 0 : i32
    return %c0_i32, %c0_i32_0 : i32, i32
  }
  func.func @transform_5(%arg0: i32) -> (i32, i32) {
    %c0_i32 = arith.constant 0 : i32
    %c0_i32_0 = arith.constant 0 : i32
    return %arg0, %c0_i32 : i32, i32
  }
}

</mosaic_0001>

<bundles_post_ra>
// kernel: tpu_custom_call.1
= control target key start
LH: loop header
LB: loop body
LE: loop exit
PB: predicated region body
PF: predicated region fallthrough
CT: control target
= control target key end

     0   :  { %10 = vsyncpa [#allocation3], 0  ;;  %s560_s0 = inlined_call_operand.hbm [shape: f32[16,128], index: 0, kind: input, shape index: {}]   ;;  %s561_s1 = inlined_call_operand.hbm [shape: f32[128,128], index: 1, kind: input, shape index: {}]   ;;  %s562_s2 = inlined_call_operand.vmem [shape: f32[1,128], index: 2, kind: input, shape index: {}]   ;;  %s563_s3 = inlined_call_operand.hbm [shape: f32[128,128], index: 3, kind: input, shape index: {}]   ;;  %s564_s4 = inlined_call_operand.vmem [shape: f32[1,128], index: 4, kind: input, shape index: {}]   ;;  %s565_s5 = inlined_call_operand.hbm [shape: f32[16,128], index: 5, kind: output, shape index: {}]  }
   0x1   :  { %11 = vsyncpa [#allocation6], 0 }
   0x2   :  { %12 = vsyncpa [#allocation4], 0  ;;  %s494_s18 = smov [#allocation5]   ;;  %s495_s20 = smov [#allocation2]  }
   0x3   :  { %s30_s19 = sshll.u32 %s494_s18, 4  ;;  %s18_s21 = sshll.u32 %s495_s20, 4  ;;  %s31_s19 = int_to_ptr.vmem [resolvable:$true] %s30_s19  ;;  %s19_s21 = int_to_ptr.vmem [resolvable:$true] %s18_s21 }
   0x4   :  { %s416_s22 = scalar_lea.vmem %s31_s19, 2048  ;;  %p421_p1 = scmp.lt.s32.totalorder %s31_s19, %s31_s19 }
   0x5   :  { %p417_p0 = scmp.ne.s32.totalorder %s31_s19, %s416_s22  ;;  %p422_p2 = scmp.lt.s32.totalorder %s416_s22, %s416_s22 }
   0x7   :  { %p423_p3 = por %p422_p2, %p421_p1 }
   0x9   :  { %p424_p4 = pnand %p423_p3, %p417_p0 }
   0xb   :  { %427 = shalt.err (!%p424_p4)
}
   0xc   :  { %s496_s23 = smov 128   ;;  %s497_s24 = smov 8  }
   0xd   :  { %36 = dma.hbm_to_vmem [thread:$0]  %s561_s1, 2048, %s31_s19, [#allocation6], %s496_s23, %s496_s23, %s497_s24  }
   0xe   :  { %s436_s27 = scalar_lea.vmem %s19_s21, 256  ;;  %p441_p6 = scmp.lt.s32.totalorder %s19_s21, %s19_s21 }
   0xf   :  { %p437_p5 = scmp.ne.s32.totalorder %s19_s21, %s436_s27  ;;  %p442_p7 = scmp.lt.s32.totalorder %s436_s27, %s436_s27 }
  0x11   :  { %p443_p8 = por %p442_p7, %p441_p6 }
  0x13   :  { %p444_p9 = pnand %p443_p8, %p437_p5 }
  0x15   :  { %447 = shalt.err (!%p444_p9)
}
  0x16   :  { %24 = dma.hbm_to_vmem [thread:$0]  %s560_s0, 256, %s19_s21, [#allocation3], %s496_s23, %s496_s23, %s497_s24  }
  0x17   :  { %s498_s30 = smov [#allocation7]  }
  0x18   :  { %s44_s6 = sshll.u32 %s498_s30, 4  ;;  %s45_s6 = int_to_ptr.vmem [resolvable:$true] %s44_s6 }
  0x19   :  { %s456_s7 = scalar_lea.vmem %s45_s6, 2048  ;;  %p461_p11 = scmp.lt.s32.totalorder %s45_s6, %s45_s6 }
  0x1a   :  { %p457_p10 = scmp.ne.s32.totalorder %s45_s6, %s456_s7  ;;  %p462_p12 = scmp.lt.s32.totalorder %s456_s7, %s456_s7 }
  0x1c   :  { %p463_p13 = por %p462_p12, %p461_p11 }
  0x1e   :  { %p464_p0 = pnand %p463_p13, %p457_p10 }
  0x20   :  { %467 = shalt.err (!%p464_p0)
}
  0x21   :  { %50 = dma.hbm_to_vmem [thread:$0]  %s563_s3, 2048, %s45_s6, [#allocation6], %s496_s23, %s496_s23, %s497_s24  }
  0x22   :  { %488 = dma.done.wait [#allocation3], 256  }
  0x23   :  { %489 = vsyncadd [#allocation3], 4294967040 }
  0x24   :  { %490 = dma.done.wait [#allocation6], 4096  }
  0x25   :  { %491 = vsyncadd [#allocation6], 4294963200  ;;  %v79_v0 = vld [vmem:[#allocation5 + $0x78] sm:$0xff]  ;;  %v78_v1 = vld [vmem:[#allocation5 + $0x70] sm:$0xff]  ;;  %s499_s10 = smov [#allocation8]  }
  0x26   :  { %328 = vmatprep.subr.mxu0 %v79_v0  ;;  %v77_v2 = vld [vmem:[#allocation5 + $0x68] sm:$0xff]  ;;  %v76_v3 = vld [vmem:[#allocation5 + $0x60] sm:$0xff]  ;;  %v62_v4 = vld [vmem:[#allocation2] sm:$0xff]  ;;  %s277_s11 = sshll.u32 %s499_s10, 4  ;;  %s278_s11 = int_to_ptr.vmem [resolvable:$true] %s277_s11 }
  0x27   :  { %329 = vmatpush3.msra.mxu0 %v79_v0  ;;  %v75_v5 = vld [vmem:[#allocation5 + $0x58] sm:$0xff]  ;;  %360 = vmatprep.mubr.f32.mxu0 %v62_v4  ;;  %v186_v7 = vld [vmem:[#allocation7 + $0x70] sm:$0xff]  ;;  %v185_v9 = vld [vmem:[#allocation7 + $0x68] sm:$0xff]  ;;  %s468_s12 = scalar_lea.vmem %s278_s11, 256  ;;  %p473_p2 = scmp.lt.s32.totalorder %s278_s11, %s278_s11 }
  0x28   :  { %330 = vmatprep.subr.mxu0 %v78_v1  ;;  %v187_v6 = vld [vmem:[#allocation7 + $0x78] sm:$0xff]  ;;  %v74_v8 = vld [vmem:[#allocation5 + $0x50] sm:$0xff]  ;;  %v73_v10 = vld [vmem:[#allocation5 + $0x48] sm:$0xff]  ;;  %p469_p1 = scmp.ne.s32.totalorder %s278_s11, %s468_s12  ;;  %p474_p3 = scmp.lt.s32.totalorder %s468_s12, %s468_s12 }
  0x29   :  { %331 = vmatpush3.msra.mxu0 %v78_v1  ;;  %363 = vmatprep.subr.mxu1 %v187_v6  ;;  %v72_v11 = vld [vmem:[#allocation5 + $0x40] sm:$0xff]  ;;  %v71_v12 = vld [vmem:[#allocation5 + $0x38] sm:$0xff]  ;;  %v70_v13 = vld [vmem:[#allocation5 + $0x30] sm:$0xff] }
  0x2a   :  { %332 = vmatprep.subr.mxu0 %v77_v2  ;;  %364 = vmatpush3.msra.mxu1 %v187_v6  ;;  %v69_v14 = vld [vmem:[#allocation5 + $0x28] sm:$0xff]  ;;  %v68_v15 = vld [vmem:[#allocation5 + $0x20] sm:$0xff]  ;;  %v67_v16 = vld [vmem:[#allocation5 + $0x18] sm:$0xff]  ;;  %p475_p4 = por %p474_p3, %p473_p2 }
  0x2b   :  { %333 = vmatpush3.msra.mxu0 %v77_v2  ;;  %365 = vmatprep.subr.mxu1 %v186_v7  ;;  %v66_v17 = vld [vmem:[#allocation5 + $0x10] sm:$0xff]  ;;  %v65_v18 = vld [vmem:[#allocation5 + $0x8] sm:$0xff]  ;;  %v64_v19 = vld [vmem:[#allocation5] sm:$0xff] }
  0x2c   :  { %334 = vmatprep.subr.mxu0 %v76_v3  ;;  %366 = vmatpush3.msra.mxu1 %v186_v7  ;;  %v63_v20 = vld [vmem:[#allocation2 + $0x8] sm:$0xff]  ;;  %v184_v21 = vld [vmem:[#allocation7 + $0x60] sm:$0xff]  ;;  %v182_v23 = vld [vmem:[#allocation7 + $0x50] sm:$0xff]  ;;  %p476_p5 = pnand %p475_p4, %p469_p1 }
  0x2d   :  { %335 = vmatpush3.msra.mxu0 %v76_v3  ;;  %367 = vmatprep.subr.mxu1 %v185_v9  ;;  %v183_v22 = vld [vmem:[#allocation7 + $0x58] sm:$0xff]  ;;  %v181_v24 = vld [vmem:[#allocation7 + $0x48] sm:$0xff]  ;;  %v180_v25 = vld [vmem:[#allocation7 + $0x40] sm:$0xff] }
  0x2e   :  { %336 = vmatprep.subr.mxu0 %v75_v5  ;;  %368 = vmatpush3.msra.mxu1 %v185_v9  ;;  %v179_v26 = vld [vmem:[#allocation7 + $0x38] sm:$0xff]  ;;  %v178_v27 = vld [vmem:[#allocation7 + $0x30] sm:$0xff]  ;;  %v177_v28 = vld [vmem:[#allocation7 + $0x28] sm:$0xff] }
  0x2f   :  { %337 = vmatpush3.msra.mxu0 %v75_v5  ;;  %369 = vmatprep.subr.mxu1 %v184_v21  ;;  %v176_v29 = vld [vmem:[#allocation7 + $0x20] sm:$0xff]  ;;  %v175_v30 = vld [vmem:[#allocation7 + $0x18] sm:$0xff]  ;;  %v174_v31 = vld [vmem:[#allocation7 + $0x10] sm:$0xff] }
  0x30   :  { %338 = vmatprep.subr.mxu0 %v74_v8  ;;  %370 = vmatpush3.msra.mxu1 %v184_v21  ;;  %v173_v32 = vld [vmem:[#allocation7 + $0x8] sm:$0xff]  ;;  %v172_v33 = vld [vmem:[#allocation7] sm:$0xff]  ;;  %v290_v34 = vld [vmem:[%s562_s2] ss:$0 sm:$0xff] }
  0x31   :  { %339 = vmatpush3.msra.mxu0 %v74_v8  ;;  %371 = vmatprep.subr.mxu1 %v183_v22  ;;  %v291_v49 = vld [vmem:[%s564_s4] ss:$0 sm:$0xff] }
  0x32   :  { %340 = vmatprep.subr.mxu0 %v73_v10  ;;  %372 = vmatpush3.msra.mxu1 %v183_v22 }
  0x33   :  { %341 = vmatpush3.msra.mxu0 %v73_v10  ;;  %373 = vmatprep.subr.mxu1 %v182_v23 }
  0x34   :  { %342 = vmatprep.subr.mxu0 %v72_v11  ;;  %374 = vmatpush3.msra.mxu1 %v182_v23 }
  0x35   :  { %343 = vmatpush3.msra.mxu0 %v72_v11  ;;  %375 = vmatprep.subr.mxu1 %v181_v24 }
  0x36   :  { %344 = vmatprep.subr.mxu0 %v71_v12  ;;  %376 = vmatpush3.msra.mxu1 %v181_v24 }
  0x37   :  { %345 = vmatpush3.msra.mxu0 %v71_v12  ;;  %377 = vmatprep.subr.mxu1 %v180_v25 }
  0x38   :  { %346 = vmatprep.subr.mxu0 %v70_v13  ;;  %378 = vmatpush3.msra.mxu1 %v180_v25 }
  0x39   :  { %347 = vmatpush3.msra.mxu0 %v70_v13  ;;  %379 = vmatprep.subr.mxu1 %v179_v26 }
  0x3a   :  { %348 = vmatprep.subr.mxu0 %v69_v14  ;;  %380 = vmatpush3.msra.mxu1 %v179_v26 }
  0x3b   :  { %349 = vmatpush3.msra.mxu0 %v69_v14  ;;  %381 = vmatprep.subr.mxu1 %v178_v27 }
  0x3c   :  { %350 = vmatprep.subr.mxu0 %v68_v15  ;;  %382 = vmatpush3.msra.mxu1 %v178_v27 }
  0x3d   :  { %351 = vmatpush3.msra.mxu0 %v68_v15  ;;  %383 = vmatprep.subr.mxu1 %v177_v28 }
  0x3e   :  { %352 = vmatprep.subr.mxu0 %v67_v16  ;;  %384 = vmatpush3.msra.mxu1 %v177_v28 }
  0x3f   :  { %353 = vmatpush3.msra.mxu0 %v67_v16  ;;  %385 = vmatprep.subr.mxu1 %v176_v29 }
  0x40   :  { %354 = vmatprep.subr.mxu0 %v66_v17  ;;  %386 = vmatpush3.msra.mxu1 %v176_v29 }
  0x41   :  { %355 = vmatpush3.msra.mxu0 %v66_v17  ;;  %387 = vmatprep.subr.mxu1 %v175_v30 }
  0x42   :  { %356 = vmatprep.subr.mxu0 %v65_v18  ;;  %388 = vmatpush3.msra.mxu1 %v175_v30 }
  0x43   :  { %357 = vmatpush3.msra.mxu0 %v65_v18  ;;  %389 = vmatprep.subr.mxu1 %v174_v31 }
  0x44   :  { %358 = vmatprep.subr.mxu0 %v64_v19  ;;  %390 = vmatpush3.msra.mxu1 %v174_v31 }
  0x45   :  { %359 = vmatpush3.msra.mxu0 %v64_v19  ;;  %391 = vmatprep.subr.mxu1 %v173_v32 }
  0x46   :  { %361 = vmatmul.mubr.f32.vlgmr.msra.gmra.mxu0 %v63_v20  ;;  %392 = vmatpush3.msra.mxu1 %v173_v32 }
  0x47   :  { %393 = vmatprep.subr.mxu1 %v172_v33 }
  0x48   :  { %394 = vmatpush3.msra.mxu1 %v172_v33 }
 0x106   :  { %v362_v35 = vpop.f32.mrf.mxu0 }
 0x107   :  { %v159_v36 = vadd.f32 %v362_v35, %v290_v34 }
 0x108   :  { %v153_v37 = vpop.f32.mrf.mxu0 }
 0x109   :  { %v165_v38 = vmul.f32 0.70710677, %v159_v36  ;;  %v154_v39 = vadd.f32 %v290_v34, %v153_v37  ;;  %v163_v46 = vmul.f32 0.5, %v159_v36 }
 0x10b   :  { %404 = verf.f32 %v165_v38  ;;  %v164_v40 = vmul.f32 0.70710677, %v154_v39  ;;  %v162_v44 = vmul.f32 0.5, %v154_v39 }
 0x10d   :  { %406 = verf.f32 %v164_v40 }
 0x118   :  { %v405_v41 = vpop.eup %404 }
 0x119   :  { %v169_v43 = vadd.f32 1.0, %v405_v41 }
 0x11a   :  { %v407_v42 = vpop.eup %406 }
 0x11b   :  { %v168_v45 = vadd.f32 1.0, %v407_v42  ;;  %v171_v48 = vmul.f32 %v169_v43, %v163_v46 }
 0x11d   :  { %v170_v47 = vmul.f32 %v168_v45, %v162_v44 }
 0x11f   :  { %395 = vmatprep.mubr.f32.mxu1 %v170_v47 }
 0x120   :  { %396 = vmatmul.mubr.f32.vlgmr.msra.gmra.mxu1 %v171_v48 }
 0x1e0   :  { %v397_v50 = vpop.f32.mrf.mxu1 }
 0x1e1   :  { %v267_v51 = vadd.f32 %v397_v50, %v291_v49 }
 0x1e2   :  { %v261_v52 = vpop.f32.mrf.mxu1 }
 0x1e3   :  { %271 = vst [vmem:[#allocation8 + $0x8] sm:$0xff] %v267_v51  ;;  %v262_v53 = vadd.f32 %v291_v49, %v261_v52 }
 0x1e5   :  { %270 = vst [vmem:[#allocation8] sm:$0xff] %v262_v53 }
 0x1e6   :  { %479 = shalt.err (!%p476_p5)
}
 0x1e7   :  { %283 = dma.vmem_to_hbm [thread:$0]  %s278_s11, 256, %s565_s5, [#allocation4], %s496_s23, %s496_s23, %s497_s24  }
 0x1e8   :  { %492 = dma.done.wait [#allocation4], 256  }
 0x1e9   :  { %493 = vsyncadd [#allocation4], 4294967040 }
 0x1ea   :  { %287 = vsyncpa [#allocation3], 1 }
 0x1eb   :  { %288 = vsyncpa [#allocation6], 1 }
 0x1ec   :  { %289 = vsyncpa [#allocation4], 1 }

</bundles_post_ra>
